<compile_context>
chip_gen: v7x
topology: tpu7x:2x2x1
jax: 0.10.0
libtpu: 0.0.40
codegen_flags: <defaults>
</compile_context>

<pallas_src>
import numpy as np
import jax
import jax.numpy as jnp
from jax.experimental import pallas as pl
from jax.experimental.pallas import tpu as pltpu

PHI = (1 + np.sqrt(5)) / 2

_LANE = 128
_SUBLANE = 8


def _cdiv(a, b):
    return -(-a // b)


def _round_up(n, m):
    return ((n + m - 1) // m) * m


def _chip_budgets():
    """Per-chip scoped-VMEM limit and per-pipeline-buffer tile budgets (bytes)."""
    vmem_cap = None
    try:
        info = pltpu.get_tpu_info()
        for name in ("vmem_capacity_bytes", "vmem_bytes", "vmem_size_bytes"):
            val = getattr(info, name, None)
            if val:
                vmem_cap = int(val)
                break
    except Exception:
        vmem_cap = None
    if vmem_cap is None:
        vmem_cap = 64 << 20                      # conservative (v7x-sized) fallback
    if vmem_cap >= (96 << 20):
        # v5e / v6e: 128 MiB physical VMEM -> large tiles, high scoped limit.
        return dict(vmem_limit=64 << 20, pass1_tile=12 << 20, pass2_tile=6 << 20)
    # v7x: 64 MiB physical VMEM -> conservative budgets.
    return dict(vmem_limit=32 << 20, pass1_tile=6 << 20, pass2_tile=2 << 20)


def _row_tiling(rows, bytes_per_row, tile_budget_bytes):
    """(tile_rows, n_tiles): pad waste bounded by <8 rows per tile, no hard row cap."""
    cap = max(_SUBLANE, ((tile_budget_bytes // bytes_per_row) // _SUBLANE) * _SUBLANE)
    n = _cdiv(rows, cap)
    tr = _round_up(_cdiv(rows, n), _SUBLANE)
    return tr, n


# ----------------------------- kernels ---------------------------------------


def _qc_reduce_kernel(x_ref, wmag2_ref, part_ref):
    """Accumulate lane-dense partial sums of x^2 * |w|^2 across row tiles."""
    @pl.when(pl.program_id(1) == 0)
    def _():
        part_ref[...] = jnp.zeros_like(part_ref)

    x = x_ref[...]                                   # (TR1, Cp) f32
    sq = x * x * wmag2_ref[...]                      # |x*w|^2 without materializing y
    # Sublane (VPU) reduce only; cross-lane sum is finished in the wrapper.
    part_ref[...] += jnp.sum(sq, axis=0, keepdims=True)[None, :, :]   # (1,1,Cp)


def _qc_normalize_kernel(x_ref, ws_ref, or_ref, oi_ref):
    """out = x * (w * scale); ws already carries the folded scalar scale."""
    x = x_ref[...]                                   # (TR2, Cp) f32
    ws = ws_ref[...]                                 # (2, Cp): [wr*scale, wi*scale]
    or_ref[...] = x * ws[0:1, :]
    oi_ref[...] = x * ws[1:2, :]


def _qc_fused_kernel(x_ref, w_ref, or_ref, oi_ref):
    """VMEM-resident fast path: reduce + normalize in one pass over x."""
    x = x_ref[...]                                   # (Bp, Cp) f32
    w = w_ref[...]                                   # (2, Cp): [wr, wi]
    wr = w[0:1, :]
    wi = w[1:2, :]
    sq = x * x * (wr * wr + wi * wi)
    ss = jnp.sum(jnp.sum(sq, axis=0, keepdims=True), axis=1, keepdims=True)  # (1,1)
    scale = 1.0 / (PHI * jnp.sqrt(ss) + 1e-8)
    or_ref[...] = x * (wr * scale)
    oi_ref[...] = x * (wi * scale)


# ----------------------------- wrapper ----------------------------------------


def quantum_consciousness_forward(x, consciousness_weights, *,
                                  pass1_tile_bytes=None,
                                  pass2_tile_bytes=None,
                                  fused_max_bytes=None):
    """x: f32[B, C]; consciousness_weights: complex64[dc]. Returns complex64[B, C]."""
    B, C = x.shape
    target_dim = C

    # ---- align_quantum_tensor: tiny FFT on the <=5-element parameter (JAX glue) ----
    # TODO(synk): FFT/IFFT has no Pallas TPU primitive; this tiny transform stays in JAX.
    freq = jnp.fft.fft(consciousness_weights)
    curr = consciousness_weights.shape[-1]
    if curr > target_dim:
        freq = freq[..., :target_dim]
    else:
        freq = jnp.concatenate(
            [freq, jnp.zeros((target_dim - curr,), dtype=freq.dtype)], axis=-1)
    w = jnp.fft.ifft(freq) / (PHI * jnp.linalg.norm(freq) + 1e-8)     # complex64[C]
    wr = jnp.real(w).astype(jnp.float32)
    wi = jnp.imag(w).astype(jnp.float32)

    budgets = _chip_budgets()
    vmem_limit = budgets["vmem_limit"]
    p1_budget = pass1_tile_bytes if pass1_tile_bytes is not None else budgets["pass1_tile"]
    p2_budget = pass2_tile_bytes if pass2_tile_bytes is not None else budgets["pass2_tile"]
    fused_max = fused_max_bytes if fused_max_bytes is not None else vmem_limit // 8

    # ---- lane-dense padding of the feature dim ----
    Cp = _round_up(C, _LANE)
    bytes_per_row = Cp * 4
    wr_p = jnp.pad(wr, (0, Cp - C)) if Cp != C else wr
    wi_p = jnp.pad(wi, (0, Cp - C)) if Cp != C else wi
    w_ri = jnp.stack([wr_p, wi_p], axis=0)                            # (2, Cp)

    xf = x.astype(jnp.float32)

    # ---- fused VMEM-resident fast path: x is read from HBM exactly once ----
    Bp_f = _round_up(B, _SUBLANE)
    if Bp_f * bytes_per_row <= fused_max:
        xp = xf if (Bp_f, Cp) == (B, C) else jnp.pad(xf, ((0, Bp_f - B), (0, Cp - C)))
        out_r, out_i = pl.pallas_call(
            _qc_fused_kernel,
            out_shape=(jax.ShapeDtypeStruct((Bp_f, Cp), jnp.float32),
                       jax.ShapeDtypeStruct((Bp_f, Cp), jnp.float32)),
            grid=(1,),
            in_specs=[pl.BlockSpec((Bp_f, Cp), lambda i: (0, 0)),
                      pl.BlockSpec((2, Cp), lambda i: (0, 0))],
            out_specs=(pl.BlockSpec((Bp_f, Cp), lambda i: (0, 0)),
                       pl.BlockSpec((Bp_f, Cp), lambda i: (0, 0))),
            compiler_params=pltpu.CompilerParams(
                dimension_semantics=("arbitrary",),
                vmem_limit_bytes=vmem_limit),
        )(xp, w_ri)
        out_r = out_r[:B, :C]
        out_i = out_i[:B, :C]
        return jax.lax.complex(out_r, out_i).astype(jnp.complex64)

    # ---- two-pass tiled path ----
    # Pass-1 tiling (reduce): only x is double-buffered -> larger tile budget.
    TR1, n1 = _row_tiling(B, bytes_per_row, p1_budget)
    n_outer = 2 if (n1 >= 4 or n1 == 2) else 1       # shard reduce over v7x's 2 TCs
    n1 = _round_up(n1, n_outer)
    TR1 = _round_up(_cdiv(B, n1), _SUBLANE)          # re-shrink TR: pad waste < 8*n1 rows
    Bp1 = n1 * TR1
    n_inner = n1 // n_outer

    # Pass-2 tiling (normalize): x + two output planes live -> tighter budget.
    TR2, n2 = _row_tiling(B, bytes_per_row, p2_budget)
    Bp2 = n2 * TR2

    Bp = max(Bp1, Bp2)
    # Zero padding: padded rows/cols contribute nothing to the Frobenius norm.
    xp = xf if (Bp, Cp) == (B, C) else jnp.pad(xf, ((0, Bp - B), (0, Cp - C)))
    wmag2 = (wr_p * wr_p + wi_p * wi_p).reshape(1, Cp)                # |w|^2 packed row

    # pass 1: lane-dense per-core partial sums of |x*w|^2
    partials = pl.pallas_call(
        _qc_reduce_kernel,
        out_shape=jax.ShapeDtypeStruct((n_outer, 1, Cp), jnp.float32),
        grid=(n_outer, n_inner),
        in_specs=[pl.BlockSpec((TR1, Cp), lambda c, i: (c * n_inner + i, 0)),
                  pl.BlockSpec((1, Cp), lambda c, i: (0, 0))],
        out_specs=pl.BlockSpec((1, 1, Cp), lambda c, i: (c, 0, 0)),
        compiler_params=pltpu.CompilerParams(
            dimension_semantics=("parallel", "arbitrary"),
            vmem_limit_bytes=vmem_limit),
    )(xp, wmag2)

    sumsq = jnp.sum(partials)                        # final cross-lane/core reduce (tiny)
    scale = 1.0 / (PHI * jnp.sqrt(sumsq) + 1e-8)
    ws = w_ri * scale                                # fold scalar into (2, Cp) weights

    # pass 2: normalized complex scaling, 'parallel' over row tiles
    out_r, out_i = pl.pallas_call(
        _qc_normalize_kernel,
        out_shape=(jax.ShapeDtypeStruct((Bp2, Cp), jnp.float32),
                   jax.ShapeDtypeStruct((Bp2, Cp), jnp.float32)),
        grid=(n2,),
        in_specs=[pl.BlockSpec((TR2, Cp), lambda i: (i, 0)),
                  pl.BlockSpec((2, Cp), lambda i: (0, 0))],
        out_specs=(pl.BlockSpec((TR2, Cp), lambda i: (i, 0)),
                   pl.BlockSpec((TR2, Cp), lambda i: (i, 0))),
        compiler_params=pltpu.CompilerParams(
            dimension_semantics=("parallel",),
            vmem_limit_bytes=vmem_limit),
    )(xp, ws)

    out_r = out_r[:B, :C]
    out_i = out_i[:B, :C]
    # TODO(synk): the real/imag -> complex64 interleave stays in JAX; an in-kernel
    # lane-interleaved store + bitcast would save re-reading the two output planes.
    return jax.lax.complex(out_r, out_i).astype(jnp.complex64)


def _reference(x, consciousness_weights):
    """Pure-JAX reference of the PyTorch forward."""
    B, C = x.shape
    dc = consciousness_weights.shape[-1]
    freq = jnp.fft.fft(consciousness_weights)
    if dc > C:
        freq = freq[..., :C]
    else:
        freq = jnp.concatenate([freq, jnp.zeros((C - dc,), dtype=freq.dtype)], axis=-1)
    w = jnp.fft.ifft(freq) / (PHI * jnp.linalg.norm(freq) + 1e-8)
    y = x.astype(jnp.float32) * w[None, :]
    return y / (PHI * jnp.linalg.norm(y) + 1e-8)


if __name__ == "__main__":
    # Module hyper-params (clamped inside __init__ just like the PyTorch code).
    dim_in, dim_consciousness = 7, 5
    dc = min(dim_consciousness, 5)

    key = jax.random.PRNGKey(0)
    k1, k2, k3, k4 = jax.random.split(key, 4)

    consciousness_weights = (
        jax.random.normal(k1, (dc,), dtype=jnp.float32)
        + 1j * jax.random.normal(k2, (dc,), dtype=jnp.float32)
    ).astype(jnp.complex64)
    # unity_projection / basis_operators / unity_operator are initialized by the
    # module but never used in forward; intentionally not materialized here.

    # 1) Small shape consistent with the module forward (fused VMEM-resident path).
    B, C = 2, 32
    x = jax.random.normal(k3, (B, C), dtype=jnp.float32)
    out = jax.block_until_ready(quantum_consciousness_forward(x, consciousness_weights))
    ref = _reference(x, consciousness_weights)
    assert out.shape == (B, C) and out.dtype == jnp.complex64
    assert np.allclose(np.asarray(out), np.asarray(ref), rtol=1e-4, atol=1e-5)

    # 2) Larger shape with row/lane padding, still the fused path.
    B2, C2 = 1030, 200
    x2 = jax.random.normal(k4, (B2, C2), dtype=jnp.float32)
    ref2 = _reference(x2, consciousness_weights)
    out2 = jax.block_until_ready(quantum_consciousness_forward(x2, consciousness_weights))
    assert out2.shape == (B2, C2) and out2.dtype == jnp.complex64
    assert np.allclose(np.asarray(out2), np.asarray(ref2), rtol=1e-4, atol=1e-6)

    # 3) Force the two-pass tiled path with the pass-1 grid split over 2 cores.
    out3 = jax.block_until_ready(quantum_consciousness_forward(
        x2, consciousness_weights,
        fused_max_bytes=0, pass1_tile_bytes=256 * 1024, pass2_tile_bytes=128 * 1024))
    assert out3.shape == (B2, C2) and out3.dtype == jnp.complex64
    assert np.allclose(np.asarray(out3), np.asarray(ref2), rtol=1e-4, atol=1e-6)

    # 4) Force the two-pass tiled path with a single-core pass-1 grid (odd tile count).
    out4 = jax.block_until_ready(quantum_consciousness_forward(
        x2, consciousness_weights,
        fused_max_bytes=0, pass1_tile_bytes=512 * 1024, pass2_tile_bytes=128 * 1024))
    assert np.allclose(np.asarray(out4), np.asarray(ref2), rtol=1e-4, atol=1e-6)

    print("KERNEL_OK")
</pallas_src>

<mosaic_0001>
module attributes {stable_mosaic.version = 11 : i64} {
  func.func @_qc_fused_kernel(%arg0: i32, %arg1: memref<8x128xf32, #tpu.memory_space<vmem>>, %arg2: memref<2x128xf32, #tpu.memory_space<vmem>>, %arg3: memref<8x128xf32, #tpu.memory_space<vmem>>, %arg4: memref<8x128xf32, #tpu.memory_space<vmem>>) attributes {dimension_semantics = [#tpu.dimension_semantics<arbitrary>], iteration_bounds = array<i64: 1>, scalar_prefetch = 0 : i64, scratch_operands = 0 : i64, tpu.core_type = #tpu.core_type<tc>, window_params = [{pipeline_mode = #tpu.pipeline_mode<synchronous>, transform_indices = @transform_0, window_bounds = array<i64: 8, 128>}, {pipeline_mode = #tpu.pipeline_mode<synchronous>, transform_indices = @transform_1, window_bounds = array<i64: 2, 128>}, {pipeline_mode = #tpu.pipeline_mode<synchronous>, transform_indices = @transform_2, window_bounds = array<i64: 8, 128>}, {pipeline_mode = #tpu.pipeline_mode<synchronous>, transform_indices = @transform_3, window_bounds = array<i64: 8, 128>}]} {
    %c0 = arith.constant 0 : index
    %c0_0 = arith.constant 0 : index
    %0 = vector.load %arg1[%c0, %c0_0] : memref<8x128xf32, #tpu.memory_space<vmem>>, vector<8x128xf32>
    %c0_1 = arith.constant 0 : index
    %c0_2 = arith.constant 0 : index
    %1 = vector.load %arg2[%c0_1, %c0_2] : memref<2x128xf32, #tpu.memory_space<vmem>>, vector<2x128xf32>
    %2 = vector.extract_strided_slice %1 {offsets = [0, 0], sizes = [1, 128], strides = [1, 1]} : vector<2x128xf32> to vector<1x128xf32>
    %3 = vector.extract_strided_slice %1 {offsets = [1, 0], sizes = [1, 128], strides = [1, 1]} : vector<2x128xf32> to vector<1x128xf32>
    %4 = arith.mulf %0, %0 : vector<8x128xf32>
    %5 = arith.mulf %2, %2 : vector<1x128xf32>
    %6 = arith.mulf %3, %3 : vector<1x128xf32>
    %7 = arith.addf %5, %6 : vector<1x128xf32>
    %8 = vector.broadcast %7 : vector<1x128xf32> to vector<8x128xf32>
    %9 = arith.mulf %4, %8 : vector<8x128xf32>
    %cst = arith.constant dense<0.000000e+00> : vector<128xf32>
    %10 = vector.multi_reduction <add>, %9, %cst [0] : vector<8x128xf32> to vector<128xf32>
    %11 = vector.shape_cast %10 : vector<128xf32> to vector<1x128xf32>
    %cst_3 = arith.constant dense<0.000000e+00> : vector<1xf32>
    %12 = vector.multi_reduction <add>, %11, %cst_3 [1] : vector<1x128xf32> to vector<1xf32>
    %13 = vector.shape_cast %12 : vector<1xf32> to vector<1x1xf32>
    %14 = math.sqrt %13 : vector<1x1xf32>
    %cst_4 = arith.constant 1.61803401 : f32
    %15 = vector.broadcast %cst_4 : f32 to vector<1x1xf32>
    %16 = arith.mulf %15, %14 : vector<1x1xf32>
    %cst_5 = arith.constant 9.99999993E-9 : f32
    %17 = vector.broadcast %cst_5 : f32 to vector<1x1xf32>
    %18 = arith.addf %16, %17 : vector<1x1xf32>
    %cst_6 = arith.constant 1.000000e+00 : f32
    %19 = vector.broadcast %cst_6 : f32 to vector<1x1xf32>
    %20 = arith.divf %19, %18 : vector<1x1xf32>
    %21 = vector.broadcast %20 : vector<1x1xf32> to vector<1x128xf32>
    %22 = arith.mulf %2, %21 : vector<1x128xf32>
    %23 = vector.broadcast %22 : vector<1x128xf32> to vector<8x128xf32>
    %24 = arith.mulf %0, %23 : vector<8x128xf32>
    %c0_7 = arith.constant 0 : index
    %c0_8 = arith.constant 0 : index
    %25 = vector.load %arg3[%c0_7, %c0_8] : memref<8x128xf32, #tpu.memory_space<vmem>>, vector<8x128xf32>
    tpu.vector_store %arg3[%c0_7, %c0_8], %24 {strides = array<i32>} : memref<8x128xf32, #tpu.memory_space<vmem>>, vector<8x128xf32>,
    %26 = vector.broadcast %20 : vector<1x1xf32> to vector<1x128xf32>
    %27 = arith.mulf %3, %26 : vector<1x128xf32>
    %28 = vector.broadcast %27 : vector<1x128xf32> to vector<8x128xf32>
    %29 = arith.mulf %0, %28 : vector<8x128xf32>
    %c0_9 = arith.constant 0 : index
    %c0_10 = arith.constant 0 : index
    %30 = vector.load %arg4[%c0_9, %c0_10] : memref<8x128xf32, #tpu.memory_space<vmem>>, vector<8x128xf32>
    tpu.vector_store %arg4[%c0_9, %c0_10], %29 {strides = array<i32>} : memref<8x128xf32, #tpu.memory_space<vmem>>, vector<8x128xf32>,
    return
  }
  func.func @transform_0(%arg0: i32) -> (i32, i32) {
    %c0_i32 = arith.constant 0 : i32
    %c0_i32_0 = arith.constant 0 : i32
    %c0_i32_1 = arith.constant 0 : i32
    return %c0_i32, %c0_i32_0 : i32, i32
  }
  func.func @transform_1(%arg0: i32) -> (i32, i32) {
    %c0_i32 = arith.constant 0 : i32
    %c0_i32_0 = arith.constant 0 : i32
    %c0_i32_1 = arith.constant 0 : i32
    return %c0_i32, %c0_i32_0 : i32, i32
  }
  func.func @transform_2(%arg0: i32) -> (i32, i32) {
    %c0_i32 = arith.constant 0 : i32
    %c0_i32_0 = arith.constant 0 : i32
    %c0_i32_1 = arith.constant 0 : i32
    return %c0_i32, %c0_i32_0 : i32, i32
  }
  func.func @transform_3(%arg0: i32) -> (i32, i32) {
    %c0_i32 = arith.constant 0 : i32
    %c0_i32_0 = arith.constant 0 : i32
    %c0_i32_1 = arith.constant 0 : i32
    return %c0_i32, %c0_i32_0 : i32, i32
  }
}

</mosaic_0001>

<bundles_post_ra>
// kernel: tpu_custom_call.1
= control target key start
LH: loop header
LB: loop body
LE: loop exit
PB: predicated region body
PF: predicated region fallthrough
CT: control target
= control target key end

     0   :  { %9 = vsyncpa [#allocation3], 0  ;;  %s242_s0 = inlined_call_operand.hbm [shape: f32[8,128], index: 0, kind: input, shape index: {}]   ;;  %s243_s1 = inlined_call_operand.vmem [shape: f32[2,128], index: 1, kind: input, shape index: {}]   ;;  %s244_s2 = inlined_call_operand.hbm [shape: f32[8,128], index: 2, kind: output, shape index: {0}]   ;;  %s245_s3 = inlined_call_operand.hbm [shape: f32[8,128], index: 3, kind: output, shape index: {1}]  }
   0x1   :  { %10 = vsyncpa [#allocation4], 0 }
   0x2   :  { %11 = vsyncpa [#allocation7], 0  ;;  %s180_s12 = smov [#allocation2]   ;;  %s108_s16 = scalar_lea.hbm %s242_s0, 128 }
   0x3   :  { %s18_s13 = sshll.u32 %s180_s12, 4  ;;  %p109_p0 = scmp.ne.s32.totalorder %s242_s0, %s108_s16  ;;  %s19_s13 = int_to_ptr.vmem [resolvable:$true] %s18_s13 }
   0x4   :  { %p112_p1 = scmp.lt.u32.totalorder %s108_s16, %s242_s0 }
   0x6   :  { %p114_p2 = pnand %p112_p1, %p109_p0 }
   0x8   :  { %117 = shalt.err (!%p114_p2)
}
   0x9   :  { %s118_s21 = scalar_lea.vmem %s19_s13, 128  ;;  %p123_p4 = scmp.lt.s32.totalorder %s19_s13, %s19_s13 }
   0xa   :  { %p119_p3 = scmp.ne.s32.totalorder %s19_s13, %s118_s21  ;;  %p124_p5 = scmp.lt.s32.totalorder %s118_s21, %s118_s21 }
   0xc   :  { %p125_p6 = por %p124_p5, %p123_p4 }
   0xe   :  { %p126_p7 = pnand %p125_p6, %p119_p3 }
  0x10   :  { %129 = shalt.err (!%p126_p7)
}
  0x11   :  { %21 = dma.hbm_to_vmem [thread:$0]  %s242_s0, 128, %s19_s13, [#allocation3]  }
  0x12   :  { %174 = dma.done.wait [#allocation3], 128  }
  0x13   :  { %175 = vsyncadd [#allocation3], 4294967168  ;;  %v35_v0 = vlaneseq  ;;  %v28_v2 = vld [vmem:[%s243_s1] sm:$0x3]  ;;  %s181_s0 = smov [#allocation5]   ;;  %s182_s26 = smov [#allocation6]  }
  0x14   :  { %v30_v3 = vmul.f32 %v28_v2, %v28_v2  ;;  %v27_v4 = vld [vmem:[#allocation2] sm:$0xff]  ;;  %s78_s1 = sshll.u32 %s181_s0, 4  ;;  %s88_s27 = sshll.u32 %s182_s26, 4  ;;  %s79_s1 = int_to_ptr.vmem [resolvable:$true] %s78_s1  ;;  %s89_s27 = int_to_ptr.vmem [resolvable:$true] %s88_s27 }
  0x15   :  { %v36_v1 = vshrl.u32 %v35_v0, 7  ;;  %v29_v7 = vmul.f32 %v27_v4, %v27_v4  ;;  %s130_s28 = scalar_lea.vmem %s79_s1, 128  ;;  %p135_p9 = scmp.lt.s32.totalorder %s79_s1, %s79_s1 }
  0x16   :  { %v32_v5 = vrot.slane %v30_v3, 1  ;;  %p131_p8 = scmp.ne.s32.totalorder %s79_s1, %s130_s28  ;;  %p136_p10 = scmp.lt.s32.totalorder %s130_s28, %s130_s28 }
  0x17   :  { %v37_v6 = vsub.s32 0, %v36_v1  ;;  %v68_v25 = vsub.s32 1, %v36_v1 }
  0x18   :  { %v34_v8 = vadd.f32 %v32_v5, %v30_v3  ;;  %p137_p11 = por %p136_p10, %p135_p9 }
  0x1a   :  { %v38_v9 = vrot.slane %v34_v8, %v37_v6  ;;  %p138_p12 = pnand %p137_p11, %p131_p8 }
  0x1c   :  { %v39_v10 = vmul.f32 %v38_v9, %v29_v7 }
  0x1e   :  { %v40_v11 = vrot.slane %v39_v10, 4 }
  0x20   :  { %v41_v12 = vadd.f32 %v40_v11, %v39_v10 }
  0x22   :  { %v42_v13 = vrot.slane %v41_v12, 2 }
  0x24   :  { %v43_v14 = vadd.f32 %v42_v13, %v41_v12 }
  0x26   :  { %v44_v15 = vrot.slane %v43_v14, 1 }
  0x28   :  { %v45_v16 = vadd.f32 %v44_v15, %v43_v14 }
  0x2a   :  { %46 = vadd.xlane.f32.xlu0 %v45_v16 }
  0xb7   :  { %v47_v17 = vpop.xlane.xlu0 %46 }
  0xb8   :  { %104 = vrsqrt.f32 %v47_v17  ;;  %vm50_vm0 = vcmp.eq.f32.partialorder %v47_v17, inf  ;;  %v53_v20 = vand.u32 2147483648, %v47_v17  ;;  %vm52_vm1 = vcmp.eq.f32.partialorder %v47_v17, 0.0 }
  0xc2   :  { %v105_v18 = vpop.eup %104 }
  0xc3   :  { %v49_v19 = vmul.f32 %v105_v18, %v47_v17 }
  0xc5   :  { %v51_v21 = vsel %vm50_vm0, %v47_v17, %v49_v19 }
  0xc6   :  { %v54_v22 = vsel %vm52_vm1, %v53_v20, %v51_v21 }
  0xc7   :  { %v55_v23 = vmul.f32 1.618034, %v54_v22 }
  0xc9   :  { %v56_v24 = vadd.f32 1e-08, %v55_v23 }
  0xcb   :  { %106 = vrcp.f32 %v56_v24 }
  0xd5   :  { %v107_v26 = vpop.eup %106 }
  0xd6   :  { %v59_v27 = vmul.f32 %v107_v26, %v28_v2 }
  0xd8   :  { %v63_v28 = vrot.slane %v59_v27, %v37_v6  ;;  %v69_v29 = vrot.slane %v59_v27, %v68_v25 }
  0xda   :  { %v64_v30 = vmul.f32 %v63_v28, %v27_v4  ;;  %v70_v31 = vmul.f32 %v69_v29, %v27_v4 }
  0xdc   :  { %65 = vst [vmem:[#allocation5] sm:$0xff] %v64_v30  ;;  %71 = vst [vmem:[#allocation6] sm:$0xff] %v70_v31 }
  0xdd   :  { %141 = shalt.err (!%p138_p12)
}
  0xde   :  { %s142_s4 = scalar_lea.hbm %s244_s2, 128 }
  0xdf   :  { %p143_p13 = scmp.ne.s32.totalorder %s244_s2, %s142_s4  ;;  %p146_p0 = scmp.lt.u32.totalorder %s142_s4, %s244_s2 }
  0xe1   :  { %p148_p1 = pnand %p146_p0, %p143_p13 }
  0xe3   :  { %151 = shalt.err (!%p148_p1)
}
  0xe4   :  { %81 = dma.vmem_to_hbm [thread:$0]  %s79_s1, 128, %s244_s2, [#allocation4]  }
  0xe5   :  { %s152_s11 = scalar_lea.vmem %s89_s27, 128  ;;  %p157_p3 = scmp.lt.s32.totalorder %s89_s27, %s89_s27 }
  0xe6   :  { %p153_p2 = scmp.ne.s32.totalorder %s89_s27, %s152_s11  ;;  %p158_p4 = scmp.lt.s32.totalorder %s152_s11, %s152_s11 }
  0xe8   :  { %p159_p5 = por %p158_p4, %p157_p3 }
  0xea   :  { %p160_p6 = pnand %p159_p5, %p153_p2 }
  0xec   :  { %163 = shalt.err (!%p160_p6)
}
  0xed   :  { %s164_s14 = scalar_lea.hbm %s245_s3, 128 }
  0xee   :  { %p165_p7 = scmp.ne.s32.totalorder %s245_s3, %s164_s14  ;;  %p168_p8 = scmp.lt.u32.totalorder %s164_s14, %s245_s3 }
  0xf0   :  { %p170_p9 = pnand %p168_p8, %p165_p7 }
  0xf2   :  { %173 = shalt.err (!%p170_p9)
}
  0xf3   :  { %91 = dma.vmem_to_hbm [thread:$0]  %s89_s27, 128, %s245_s3, [#allocation7]  }
  0xf4   :  { %176 = dma.done.wait [#allocation4], 128  }
  0xf5   :  { %177 = vsyncadd [#allocation4], 4294967168 }
  0xf6   :  { %178 = dma.done.wait [#allocation7], 128  }
  0xf7   :  { %179 = vsyncadd [#allocation7], 4294967168 }
  0xf8   :  { %98 = vsyncpa [#allocation3], 1 }
  0xf9   :  { %99 = vsyncpa [#allocation4], 1 }
  0xfa   :  { %100 = vsyncpa [#allocation7], 1 }

</bundles_post_ra>
